<compile_context>
chip_gen: v5e
topology: v5e:2x2
jax: 0.10.0
libtpu: 0.0.40
codegen_flags: <defaults>
</compile_context>

<pallas_src>
import math
import jax
import jax.numpy as jnp
from jax.experimental import pallas as pl
from jax.experimental.pallas import tpu as pltpu


def _quadruple(v):
    if isinstance(v, (tuple, list)):
        assert len(v) == 4
        return tuple(v)
    return (v,) * 4


def _round_up(x, m):
    return ((x + m - 1) // m) * m


# ----------------------------------------------------------------------------
# Fused shifted-window GEMM kernel (3-D transposed conv for one L-frame slab).
# ----------------------------------------------------------------------------
def _make_conv_kernel(kh, kw, hd, wd, Ho, Wo_pad, Cin, Npad):
    HWo = Ho * Wo_pad

    def kernel(x_ref, w_ref, o_ref):
        # x_ref : (Hp, Wp, Cin)        padded input D-slice (compute dtype)
        # w_ref : (kh*kw, Cin, Npad)   weight taps for current D-kernel index
        # o_ref : (HWo, Npad) f32      output block, revisited across the k_d axis
        acc = jnp.zeros((HWo, Npad), jnp.float32)
        for b in range(kh):
            for c in range(kw):
                win = x_ref[b * hd:b * hd + Ho, c * wd:c * wd + Wo_pad, :]
                lhs = win.reshape(HWo, Cin)
                acc = acc + jnp.dot(lhs, w_ref[b * kw + c],
                                    preferred_element_type=jnp.float32)

        a_idx = pl.program_id(2)

        @pl.when(a_idx == 0)
        def _init():
            o_ref[...] = acc

        @pl.when(a_idx != 0)
        def _accumulate():
            o_ref[...] = o_ref[...] + acc

    return kernel


# ----------------------------------------------------------------------------
# ConvTranspose4d module (JAX/Pallas re-implementation of the PyTorch module).
# ----------------------------------------------------------------------------
class ConvTranspose4d:
    def __init__(self, in_channels, out_channels, kernel_size, stride=1,
                 padding=0, output_padding=0, groups=1, bias=False,
                 dilation=1, *, key, compute_dtype=jnp.bfloat16):
        kernel_size = _quadruple(kernel_size)
        stride = _quadruple(stride)
        padding = _quadruple(padding)
        dilation = _quadruple(dilation)
        output_padding = _quadruple(output_padding)
        if not all(op < st or op < dl
                   for op, st, dl in zip(output_padding, stride, dilation)):
            raise ValueError("output padding must be smaller than stride or dilation")
        if in_channels % groups != 0 or out_channels % groups != 0:
            raise ValueError("channels must be divisible by groups")
        assert groups == 1, "Groups other than 1 not yet implemented!"

        self.in_channels = in_channels
        self.out_channels = out_channels
        self.kernel_size = kernel_size
        self.stride = stride
        self.padding = padding
        self.output_padding = output_padding
        self.dilation = dilation
        self.groups = groups
        self.compute_dtype = compute_dtype

        # Deterministic kaiming_uniform_(a=sqrt(5)) equivalent:
        # bound = 1/sqrt(fan_in), fan_in = (out_channels//groups) * prod(kernel)
        w_shape = (in_channels, out_channels // groups) + kernel_size
        fan_in = (out_channels // groups) * math.prod(kernel_size)
        bound = 1.0 / math.sqrt(fan_in)
        kw_key, kb_key = jax.random.split(key)
        self.weight = jax.random.uniform(kw_key, w_shape, jnp.float32,
                                         minval=-bound, maxval=bound)
        if bias:
            self.bias = jax.random.uniform(kb_key, (out_channels,), jnp.float32,
                                           minval=-bound, maxval=bound)
        else:
            self.bias = None

        # ---- weight prep hoisted out of forward (flip spatial taps, reorder,
        #      pad the output-column axis to a lane-dense multiple of 128) ----
        lk, kd, kh, kw = kernel_size
        self.n_cols = lk * out_channels
        self.n_pad = _round_up(self.n_cols, 128)
        wf = self.weight[:, :, :, ::-1, ::-1, ::-1]          # flip kd, kh, kw
        wmat = jnp.transpose(wf, (3, 4, 5, 0, 2, 1))         # (kd,kh,kw,Cin,lk,Cout)
        wmat = wmat.reshape(kd, kh * kw, in_channels, self.n_cols)
        wmat = jnp.pad(wmat, ((0, 0), (0, 0), (0, 0), (0, self.n_pad - self.n_cols)))
        self.wmat = wmat.astype(compute_dtype)

    def __call__(self, x):
        B, Cin, L, Di, Hi, Wi = x.shape
        assert Cin == self.in_channels
        lk, kd, kh, kw = self.kernel_size
        ls, ds_, hs, ws = self.stride
        lp, dp, hp, wp = self.padding
        lop, dop, hop, wop = self.output_padding
        ld, dd, hd, wd = self.dilation
        Cout = self.out_channels

        Lo = (L - 1) * ls - 2 * lp + ld * (lk - 1) + lop + 1
        Do = (Di - 1) * ds_ - 2 * dp + dd * (kd - 1) + dop + 1
        Ho = (Hi - 1) * hs - 2 * hp + hd * (kh - 1) + hop + 1
        Wo = (Wi - 1) * ws - 2 * wp + wd * (kw - 1) + wop + 1

        BL = B * L
        Wo_pad = _round_up(Wo, 8)        # sublane-aligned GEMM rows
        Npad = self.n_pad                # lane-dense GEMM columns
        HWo = Ho * Wo_pad

        # ---- glue: channels-last, fold L into batch ----
        xcl = jnp.transpose(x, (0, 2, 3, 4, 5, 1)).reshape(BL, Di, Hi, Wi, Cin)

        # ---- glue: stride-dilate the input (fast path skips it for stride 1) ----
        if (ds_, hs, ws) == (1, 1, 1):
            xdil = xcl
        else:
            Dd, Hd, Wd_ = (Di - 1) * ds_ + 1, (Hi - 1) * hs + 1, (Wi - 1) * ws + 1
            xdil = jnp.zeros((BL, Dd, Hd, Wd_, Cin), x.dtype)
            xdil = xdil.at[:, ::ds_, ::hs, ::ws, :].set(xcl)

        # ---- glue: zero-pad so every kernel tap reads an in-bounds window ----
        pdl = dd * (kd - 1) - dp
        phl = hd * (kh - 1) - hp
        pwl = wd * (kw - 1) - wp
        # TODO(synk): negative effective padding (i.e. output cropping) not supported here.
        assert pdl >= 0 and phl >= 0 and pwl >= 0
        pads = ((0, 0), (pdl, pdl + dop), (phl, phl + hop),
                (pwl, pwl + wop + (Wo_pad - Wo)), (0, 0))
        xpad = xdil if all(p == (0, 0) for p in pads) else jnp.pad(xdil, pads)
        xpad = xpad.astype(self.compute_dtype)

        Dp = Do + dd * (kd - 1)
        Hp = Ho + hd * (kh - 1)
        Wp = Wo_pad + wd * (kw - 1)
        assert xpad.shape == (BL, Dp, Hp, Wp, Cin), (xpad.shape, (BL, Dp, Hp, Wp, Cin))

        kernel = _make_conv_kernel(kh, kw, hd, wd, Ho, Wo_pad, Cin, Npad)

        flops = 2 * BL * Do * HWo * (kd * kh * kw * Cin) * Npad
        bytes_accessed = (xpad.size * xpad.dtype.itemsize * kd
                          + self.wmat.size * self.wmat.dtype.itemsize
                          + BL * Do * HWo * Npad * 4)

        # TODO(synk): for very large spatial frames / channel counts, add H and
        # Cin tiling (with halo) so per-step blocks stay within v7x's 64 MiB VMEM.
        y = pl.pallas_call(
            kernel,
            out_shape=jax.ShapeDtypeStruct((BL, Do, HWo, Npad), jnp.float32),
            grid=(BL, Do, kd),
            in_specs=[
                pl.BlockSpec((None, None, Hp, Wp, Cin),
                             lambda bl, d, a: (bl, d + a * dd, 0, 0, 0)),
                pl.BlockSpec((None, kh * kw, Cin, Npad),
                             lambda bl, d, a: (a, 0, 0, 0)),
            ],
            out_specs=pl.BlockSpec((None, None, HWo, Npad),
                                   lambda bl, d, a: (bl, d, 0, 0)),
            compiler_params=pltpu.CompilerParams(
                dimension_semantics=("parallel", "parallel", "arbitrary"),
                vmem_limit_bytes=48 * 1024 * 1024),
            cost_estimate=pl.CostEstimate(flops=flops, transcendentals=0,
                                          bytes_accessed=bytes_accessed),
        )(xpad, self.wmat)

        # ---- glue: strip the N / W padding and split (lk, Cout) ----
        y = y[..., :lk * Cout].reshape(B, L, Do, Ho, Wo_pad, lk, Cout)[:, :, :, :, :Wo]

        # ---- vectorized L-dimension scatter-add (same math as the torch loop:
        #      out[:, :, ls*j - lp + i] += frame(i, j)) ----
        yt = jnp.transpose(y, (0, 6, 5, 1, 2, 3, 4))      # (B, Cout, lk, L, Do, Ho, Wo)
        yt = yt.reshape(B, Cout, lk * L, Do, Ho, Wo)
        of = (ls * jnp.arange(L)[None, :] + (jnp.arange(lk)[:, None] - lp)).reshape(-1)
        valid = (of >= 0) & (of < Lo)
        idx = jnp.clip(of, 0, Lo - 1)
        yt = yt * valid[None, None, :, None, None, None].astype(yt.dtype)
        out = jnp.zeros((B, Cout, Lo, Do, Ho, Wo), jnp.float32).at[:, :, idx].add(yt)

        if self.bias is not None:
            out = out + self.bias.reshape(1, -1, 1, 1, 1, 1)
        return out


# ----------------------------------------------------------------------------
# Pure-JAX reference (stride=1, padding=0, dilation=1, output_padding=0 case).
# ----------------------------------------------------------------------------
def reference_simple(x, w):
    B, Cin, L, Di, Hi, Wi = x.shape
    _, Cout, LK, KD, KH, KW = w.shape
    Lo, Do, Ho, Wo = L + LK - 1, Di + KD - 1, Hi + KH - 1, Wi + KW - 1
    out = jnp.zeros((B, Cout, Lo, Do, Ho, Wo), jnp.float32)
    for i in range(LK):
        for a in range(KD):
            for b_ in range(KH):
                for c in range(KW):
                    contrib = jnp.einsum('bcldhw,co->boldhw', x,
                                         w[:, :, i, a, b_, c])
                    out = out.at[:, :, i:i + L, a:a + Di,
                                 b_:b_ + Hi, c:c + Wi].add(contrib)
    return out


if __name__ == "__main__":
    key = jax.random.PRNGKey(0)
    kx, kmod = jax.random.split(key)

    B, Cin, Cout = 2, 4, 8
    L, Di, Hi, Wi = 3, 4, 5, 5
    ksize = (2, 3, 3, 3)

    x = jax.random.normal(kx, (B, Cin, L, Di, Hi, Wi), jnp.float32)
    mod = ConvTranspose4d(Cin, Cout, ksize, stride=1, padding=0,
                          output_padding=0, groups=1, bias=False,
                          dilation=1, key=kmod)

    fwd = jax.jit(lambda inp: mod(inp))
    out = jax.block_until_ready(fwd(x))

    # Reference computed on bf16-rounded operands (the kernel uses bf16 MXU
    # inputs with f32 accumulation), so the comparison is tight.
    xr = x.astype(jnp.bfloat16).astype(jnp.float32)
    wr = mod.weight.astype(jnp.bfloat16).astype(jnp.float32)
    ref = reference_simple(xr, wr)
    assert out.shape == ref.shape, (out.shape, ref.shape)
    err = float(jnp.max(jnp.abs(out - ref)))
    assert err < 2e-3, f"max abs err {err}"

    print("KERNEL_OK")
</pallas_src>

<mosaic_0001>
module attributes {stable_mosaic.version = 11 : i64} {
  func.func @kernel(%arg0: i32, %arg1: i32, %arg2: i32, %arg3: memref<1x1x9x10x4xbf16, #tpu.memory_space<vmem>>, %arg4: memref<1x9x4x128xbf16, #tpu.memory_space<vmem>>, %arg5: memref<1x1x56x128xf32, #tpu.memory_space<vmem>>) attributes {dimension_semantics = [#tpu.dimension_semantics<parallel>, #tpu.dimension_semantics<parallel>, #tpu.dimension_semantics<arbitrary>], iteration_bounds = array<i64: 6, 6, 3>, scalar_prefetch = 0 : i64, scratch_operands = 0 : i64, tpu.core_type = #tpu.core_type<tc>, window_params = [{transform_indices = @transform_0, window_bounds = array<i64: 1, 1, 9, 10, 4>}, {transform_indices = @transform_1, window_bounds = array<i64: 1, 9, 4, 128>}, {transform_indices = @transform_2, window_bounds = array<i64: 1, 1, 56, 128>}]} {
    %cst = arith.constant 0.000000e+00 : f32
    %0 = vector.broadcast %cst : f32 to vector<56x128xf32>
    %c0 = arith.constant 0 : index
    %c0_0 = arith.constant 0 : index
    %c0_1 = arith.constant 0 : index
    %c0_2 = arith.constant 0 : index
    %c0_3 = arith.constant 0 : index
    %1 = vector.load %arg3[%c0, %c0_0, %c0_1, %c0_2, %c0_3] : memref<1x1x9x10x4xbf16, #tpu.memory_space<vmem>>, vector<1x1x7x8x4xbf16>
    %2 = vector.shape_cast %1 : vector<1x1x7x8x4xbf16> to vector<7x8x4xbf16>
    %3 = vector.shape_cast %2 : vector<7x8x4xbf16> to vector<56x4xbf16>
    %c0_4 = arith.constant 0 : index
    %c0_5 = arith.constant 0 : index
    %c0_6 = arith.constant 0 : index
    %c0_7 = arith.constant 0 : index
    %4 = vector.load %arg4[%c0_4, %c0_5, %c0_6, %c0_7] : memref<1x9x4x128xbf16, #tpu.memory_space<vmem>>, vector<1x1x4x128xbf16>
    %5 = vector.shape_cast %4 : vector<1x1x4x128xbf16> to vector<4x128xbf16>
    %cst_8 = arith.constant dense<0.000000e+00> : vector<56x128xf32>
    %6 = tpu.matmul %3, %5, %cst_8 {dimension_numbers = #tpu.dot_dimension_numbers<[1], [0], [0], [1], [0, 0, 1, 1], [], []>} : vector<56x4xbf16>, vector<4x128xbf16>, vector<56x128xf32> -> vector<56x128xf32>
    %7 = arith.addf %0, %6 : vector<56x128xf32>
    %c0_9 = arith.constant 0 : index
    %c0_10 = arith.constant 0 : index
    %c0_11 = arith.constant 0 : index
    %c1 = arith.constant 1 : index
    %c0_12 = arith.constant 0 : index
    %8 = vector.load %arg3[%c0_9, %c0_10, %c0_11, %c1, %c0_12] : memref<1x1x9x10x4xbf16, #tpu.memory_space<vmem>>, vector<1x1x7x8x4xbf16>
    %9 = vector.shape_cast %8 : vector<1x1x7x8x4xbf16> to vector<7x8x4xbf16>
    %10 = vector.shape_cast %9 : vector<7x8x4xbf16> to vector<56x4xbf16>
    %c0_13 = arith.constant 0 : index
    %c1_14 = arith.constant 1 : index
    %c0_15 = arith.constant 0 : index
    %c0_16 = arith.constant 0 : index
    %11 = vector.load %arg4[%c0_13, %c1_14, %c0_15, %c0_16] : memref<1x9x4x128xbf16, #tpu.memory_space<vmem>>, vector<1x1x4x128xbf16>
    %12 = vector.shape_cast %11 : vector<1x1x4x128xbf16> to vector<4x128xbf16>
    %cst_17 = arith.constant dense<0.000000e+00> : vector<56x128xf32>
    %13 = tpu.matmul %10, %12, %cst_17 {dimension_numbers = #tpu.dot_dimension_numbers<[1], [0], [0], [1], [0, 0, 1, 1], [], []>} : vector<56x4xbf16>, vector<4x128xbf16>, vector<56x128xf32> -> vector<56x128xf32>
    %14 = arith.addf %7, %13 : vector<56x128xf32>
    %c0_18 = arith.constant 0 : index
    %c0_19 = arith.constant 0 : index
    %c0_20 = arith.constant 0 : index
    %c2 = arith.constant 2 : index
    %c0_21 = arith.constant 0 : index
    %15 = vector.load %arg3[%c0_18, %c0_19, %c0_20, %c2, %c0_21] : memref<1x1x9x10x4xbf16, #tpu.memory_space<vmem>>, vector<1x1x7x8x4xbf16>
    %16 = vector.shape_cast %15 : vector<1x1x7x8x4xbf16> to vector<7x8x4xbf16>
    %17 = vector.shape_cast %16 : vector<7x8x4xbf16> to vector<56x4xbf16>
    %c0_22 = arith.constant 0 : index
    %c2_23 = arith.constant 2 : index
    %c0_24 = arith.constant 0 : index
    %c0_25 = arith.constant 0 : index
    %18 = vector.load %arg4[%c0_22, %c2_23, %c0_24, %c0_25] : memref<1x9x4x128xbf16, #tpu.memory_space<vmem>>, vector<1x1x4x128xbf16>
    %19 = vector.shape_cast %18 : vector<1x1x4x128xbf16> to vector<4x128xbf16>
    %cst_26 = arith.constant dense<0.000000e+00> : vector<56x128xf32>
    %20 = tpu.matmul %17, %19, %cst_26 {dimension_numbers = #tpu.dot_dimension_numbers<[1], [0], [0], [1], [0, 0, 1, 1], [], []>} : vector<56x4xbf16>, vector<4x128xbf16>, vector<56x128xf32> -> vector<56x128xf32>
    %21 = arith.addf %14, %20 : vector<56x128xf32>
    %c0_27 = arith.constant 0 : index
    %c0_28 = arith.constant 0 : index
    %c1_29 = arith.constant 1 : index
    %c0_30 = arith.constant 0 : index
    %c0_31 = arith.constant 0 : index
    %22 = vector.load %arg3[%c0_27, %c0_28, %c1_29, %c0_30, %c0_31] : memref<1x1x9x10x4xbf16, #tpu.memory_space<vmem>>, vector<1x1x7x8x4xbf16>
    %23 = vector.shape_cast %22 : vector<1x1x7x8x4xbf16> to vector<7x8x4xbf16>
    %24 = vector.shape_cast %23 : vector<7x8x4xbf16> to vector<56x4xbf16>
    %c0_32 = arith.constant 0 : index
    %c3 = arith.constant 3 : index
    %c0_33 = arith.constant 0 : index
    %c0_34 = arith.constant 0 : index
    %25 = vector.load %arg4[%c0_32, %c3, %c0_33, %c0_34] : memref<1x9x4x128xbf16, #tpu.memory_space<vmem>>, vector<1x1x4x128xbf16>
    %26 = vector.shape_cast %25 : vector<1x1x4x128xbf16> to vector<4x128xbf16>
    %cst_35 = arith.constant dense<0.000000e+00> : vector<56x128xf32>
    %27 = tpu.matmul %24, %26, %cst_35 {dimension_numbers = #tpu.dot_dimension_numbers<[1], [0], [0], [1], [0, 0, 1, 1], [], []>} : vector<56x4xbf16>, vector<4x128xbf16>, vector<56x128xf32> -> vector<56x128xf32>
    %28 = arith.addf %21, %27 : vector<56x128xf32>
    %c0_36 = arith.constant 0 : index
    %c0_37 = arith.constant 0 : index
    %c1_38 = arith.constant 1 : index
    %c1_39 = arith.constant 1 : index
    %c0_40 = arith.constant 0 : index
    %29 = vector.load %arg3[%c0_36, %c0_37, %c1_38, %c1_39, %c0_40] : memref<1x1x9x10x4xbf16, #tpu.memory_space<vmem>>, vector<1x1x7x8x4xbf16>
    %30 = vector.shape_cast %29 : vector<1x1x7x8x4xbf16> to vector<7x8x4xbf16>
    %31 = vector.shape_cast %30 : vector<7x8x4xbf16> to vector<56x4xbf16>
    %c0_41 = arith.constant 0 : index
    %c4 = arith.constant 4 : index
    %c0_42 = arith.constant 0 : index
    %c0_43 = arith.constant 0 : index
    %32 = vector.load %arg4[%c0_41, %c4, %c0_42, %c0_43] : memref<1x9x4x128xbf16, #tpu.memory_space<vmem>>, vector<1x1x4x128xbf16>
    %33 = vector.shape_cast %32 : vector<1x1x4x128xbf16> to vector<4x128xbf16>
    %cst_44 = arith.constant dense<0.000000e+00> : vector<56x128xf32>
    %34 = tpu.matmul %31, %33, %cst_44 {dimension_numbers = #tpu.dot_dimension_numbers<[1], [0], [0], [1], [0, 0, 1, 1], [], []>} : vector<56x4xbf16>, vector<4x128xbf16>, vector<56x128xf32> -> vector<56x128xf32>
    %35 = arith.addf %28, %34 : vector<56x128xf32>
    %c0_45 = arith.constant 0 : index
    %c0_46 = arith.constant 0 : index
    %c1_47 = arith.constant 1 : index
    %c2_48 = arith.constant 2 : index
    %c0_49 = arith.constant 0 : index
    %36 = vector.load %arg3[%c0_45, %c0_46, %c1_47, %c2_48, %c0_49] : memref<1x1x9x10x4xbf16, #tpu.memory_space<vmem>>, vector<1x1x7x8x4xbf16>
    %37 = vector.shape_cast %36 : vector<1x1x7x8x4xbf16> to vector<7x8x4xbf16>
    %38 = vector.shape_cast %37 : vector<7x8x4xbf16> to vector<56x4xbf16>
    %c0_50 = arith.constant 0 : index
    %c5 = arith.constant 5 : index
    %c0_51 = arith.constant 0 : index
    %c0_52 = arith.constant 0 : index
    %39 = vector.load %arg4[%c0_50, %c5, %c0_51, %c0_52] : memref<1x9x4x128xbf16, #tpu.memory_space<vmem>>, vector<1x1x4x128xbf16>
    %40 = vector.shape_cast %39 : vector<1x1x4x128xbf16> to vector<4x128xbf16>
    %cst_53 = arith.constant dense<0.000000e+00> : vector<56x128xf32>
    %41 = tpu.matmul %38, %40, %cst_53 {dimension_numbers = #tpu.dot_dimension_numbers<[1], [0], [0], [1], [0, 0, 1, 1], [], []>} : vector<56x4xbf16>, vector<4x128xbf16>, vector<56x128xf32> -> vector<56x128xf32>
    %42 = arith.addf %35, %41 : vector<56x128xf32>
    %c0_54 = arith.constant 0 : index
    %c0_55 = arith.constant 0 : index
    %c2_56 = arith.constant 2 : index
    %c0_57 = arith.constant 0 : index
    %c0_58 = arith.constant 0 : index
    %43 = vector.load %arg3[%c0_54, %c0_55, %c2_56, %c0_57, %c0_58] : memref<1x1x9x10x4xbf16, #tpu.memory_space<vmem>>, vector<1x1x7x8x4xbf16>
    %44 = vector.shape_cast %43 : vector<1x1x7x8x4xbf16> to vector<7x8x4xbf16>
    %45 = vector.shape_cast %44 : vector<7x8x4xbf16> to vector<56x4xbf16>
    %c0_59 = arith.constant 0 : index
    %c6 = arith.constant 6 : index
    %c0_60 = arith.constant 0 : index
    %c0_61 = arith.constant 0 : index
    %46 = vector.load %arg4[%c0_59, %c6, %c0_60, %c0_61] : memref<1x9x4x128xbf16, #tpu.memory_space<vmem>>, vector<1x1x4x128xbf16>
    %47 = vector.shape_cast %46 : vector<1x1x4x128xbf16> to vector<4x128xbf16>
    %cst_62 = arith.constant dense<0.000000e+00> : vector<56x128xf32>
    %48 = tpu.matmul %45, %47, %cst_62 {dimension_numbers = #tpu.dot_dimension_numbers<[1], [0], [0], [1], [0, 0, 1, 1], [], []>} : vector<56x4xbf16>, vector<4x128xbf16>, vector<56x128xf32> -> vector<56x128xf32>
    %49 = arith.addf %42, %48 : vector<56x128xf32>
    %c0_63 = arith.constant 0 : index
    %c0_64 = arith.constant 0 : index
    %c2_65 = arith.constant 2 : index
    %c1_66 = arith.constant 1 : index
    %c0_67 = arith.constant 0 : index
    %50 = vector.load %arg3[%c0_63, %c0_64, %c2_65, %c1_66, %c0_67] : memref<1x1x9x10x4xbf16, #tpu.memory_space<vmem>>, vector<1x1x7x8x4xbf16>
    %51 = vector.shape_cast %50 : vector<1x1x7x8x4xbf16> to vector<7x8x4xbf16>
    %52 = vector.shape_cast %51 : vector<7x8x4xbf16> to vector<56x4xbf16>
    %c0_68 = arith.constant 0 : index
    %c7 = arith.constant 7 : index
    %c0_69 = arith.constant 0 : index
    %c0_70 = arith.constant 0 : index
    %53 = vector.load %arg4[%c0_68, %c7, %c0_69, %c0_70] : memref<1x9x4x128xbf16, #tpu.memory_space<vmem>>, vector<1x1x4x128xbf16>
    %54 = vector.shape_cast %53 : vector<1x1x4x128xbf16> to vector<4x128xbf16>
    %cst_71 = arith.constant dense<0.000000e+00> : vector<56x128xf32>
    %55 = tpu.matmul %52, %54, %cst_71 {dimension_numbers = #tpu.dot_dimension_numbers<[1], [0], [0], [1], [0, 0, 1, 1], [], []>} : vector<56x4xbf16>, vector<4x128xbf16>, vector<56x128xf32> -> vector<56x128xf32>
    %56 = arith.addf %49, %55 : vector<56x128xf32>
    %c0_72 = arith.constant 0 : index
    %c0_73 = arith.constant 0 : index
    %c2_74 = arith.constant 2 : index
    %c2_75 = arith.constant 2 : index
    %c0_76 = arith.constant 0 : index
    %57 = vector.load %arg3[%c0_72, %c0_73, %c2_74, %c2_75, %c0_76] : memref<1x1x9x10x4xbf16, #tpu.memory_space<vmem>>, vector<1x1x7x8x4xbf16>
    %58 = vector.shape_cast %57 : vector<1x1x7x8x4xbf16> to vector<7x8x4xbf16>
    %59 = vector.shape_cast %58 : vector<7x8x4xbf16> to vector<56x4xbf16>
    %c0_77 = arith.constant 0 : index
    %c8 = arith.constant 8 : index
    %c0_78 = arith.constant 0 : index
    %c0_79 = arith.constant 0 : index
    %60 = vector.load %arg4[%c0_77, %c8, %c0_78, %c0_79] : memref<1x9x4x128xbf16, #tpu.memory_space<vmem>>, vector<1x1x4x128xbf16>
    %61 = vector.shape_cast %60 : vector<1x1x4x128xbf16> to vector<4x128xbf16>
    %cst_80 = arith.constant dense<0.000000e+00> : vector<56x128xf32>
    %62 = tpu.matmul %59, %61, %cst_80 {dimension_numbers = #tpu.dot_dimension_numbers<[1], [0], [0], [1], [0, 0, 1, 1], [], []>} : vector<56x4xbf16>, vector<4x128xbf16>, vector<56x128xf32> -> vector<56x128xf32>
    %63 = arith.addf %56, %62 : vector<56x128xf32>
    %c0_i32 = arith.constant 0 : i32
    %64 = arith.cmpi eq, %arg2, %c0_i32 : i32
    %65 = arith.extui %64 : i1 to i32
    %c0_i32_81 = arith.constant 0 : i32
    %66 = arith.cmpi ne, %65, %c0_i32_81 : i32
    scf.if %66 {
      %c0_84 = arith.constant 0 : index
      %c0_85 = arith.constant 0 : index
      %c0_86 = arith.constant 0 : index
      %c0_87 = arith.constant 0 : index
      %70 = vector.load %arg5[%c0_84, %c0_85, %c0_86, %c0_87] : memref<1x1x56x128xf32, #tpu.memory_space<vmem>>, vector<1x1x56x128xf32>
      %71 = vector.shape_cast %70 : vector<1x1x56x128xf32> to vector<56x128xf32>
      %72 = vector.shape_cast %63 : vector<56x128xf32> to vector<1x1x56x128xf32>
      tpu.vector_store %arg5[%c0_84, %c0_85, %c0_86, %c0_87], %72 {strides = array<i32>} : memref<1x1x56x128xf32, #tpu.memory_space<vmem>>, vector<1x1x56x128xf32>,
    } else {
    }
    %c0_i32_82 = arith.constant 0 : i32
    %67 = arith.cmpi ne, %arg2, %c0_i32_82 : i32
    %68 = arith.extui %67 : i1 to i32
    %c0_i32_83 = arith.constant 0 : i32
    %69 = arith.cmpi ne, %68, %c0_i32_83 : i32
    scf.if %69 {
      %c0_84 = arith.constant 0 : index
      %c0_85 = arith.constant 0 : index
      %c0_86 = arith.constant 0 : index
      %c0_87 = arith.constant 0 : index
      %70 = vector.load %arg5[%c0_84, %c0_85, %c0_86, %c0_87] : memref<1x1x56x128xf32, #tpu.memory_space<vmem>>, vector<1x1x56x128xf32>
      %71 = vector.shape_cast %70 : vector<1x1x56x128xf32> to vector<56x128xf32>
      %72 = arith.addf %71, %63 : vector<56x128xf32>
      %c0_88 = arith.constant 0 : index
      %c0_89 = arith.constant 0 : index
      %c0_90 = arith.constant 0 : index
      %c0_91 = arith.constant 0 : index
      %73 = vector.load %arg5[%c0_88, %c0_89, %c0_90, %c0_91] : memref<1x1x56x128xf32, #tpu.memory_space<vmem>>, vector<1x1x56x128xf32>
      %74 = vector.shape_cast %73 : vector<1x1x56x128xf32> to vector<56x128xf32>
      %75 = vector.shape_cast %72 : vector<56x128xf32> to vector<1x1x56x128xf32>
      tpu.vector_store %arg5[%c0_88, %c0_89, %c0_90, %c0_91], %75 {strides = array<i32>} : memref<1x1x56x128xf32, #tpu.memory_space<vmem>>, vector<1x1x56x128xf32>,
    } else {
    }
    return
  }
  func.func @transform_0(%arg0: i32, %arg1: i32, %arg2: i32) -> (i32, i32, i32, i32, i32) {
    %c1_i32 = arith.constant 1 : i32
    %0 = arith.muli %arg2, %c1_i32 : i32
    %1 = arith.addi %arg1, %0 : i32
    %c0_i32 = arith.constant 0 : i32
    %c0_i32_0 = arith.constant 0 : i32
    %c0_i32_1 = arith.constant 0 : i32
    %c0_i32_2 = arith.constant 0 : i32
    return %arg0, %1, %c0_i32, %c0_i32_0, %c0_i32_1 : i32, i32, i32, i32, i32
  }
  func.func @transform_1(%arg0: i32, %arg1: i32, %arg2: i32) -> (i32, i32, i32, i32) {
    %c0_i32 = arith.constant 0 : i32
    %c0_i32_0 = arith.constant 0 : i32
    %c0_i32_1 = arith.constant 0 : i32
    %c0_i32_2 = arith.constant 0 : i32
    return %arg2, %c0_i32, %c0_i32_0, %c0_i32_1 : i32, i32, i32, i32
  }
  func.func @transform_2(%arg0: i32, %arg1: i32, %arg2: i32) -> (i32, i32, i32, i32) {
    %c0_i32 = arith.constant 0 : i32
    %c0_i32_0 = arith.constant 0 : i32
    %c0_i32_1 = arith.constant 0 : i32
    return %arg0, %arg1, %c0_i32, %c0_i32_0 : i32, i32, i32, i32
  }
}

</mosaic_0001>

<bundles_post_ra>
// kernel: _lambda_.1
= control target key start
LH: loop header
LB: loop body
LE: loop exit
PB: predicated region body
PF: predicated region fallthrough
CT: control target
= control target key end

     0   :  { %s1757_s9 = smov 0   ;;  %s1759_s10 = smov 0   ;;  %s2179_s0 = inlined_call_operand.vmem [shape: bf16[6,8,9,10,4], index: 0, kind: input, shape index: {}]   ;;  %s2180_s1 = inlined_call_operand.vmem [shape: bf16[3,9,4,128], index: 1, kind: input, shape index: {}]   ;;  %s2181_s2 = inlined_call_operand.vmem [shape: f32[6,6,56,128], index: 2, kind: output, shape index: {}]  }
   0x1   :  { %s1761_s11 = smov 0   ;;  %s1763_s12 = smov 0  }
   0x2   :  { %s1765_s13 = smov 0   ;;  %s1767_s14 = smov 0  }
   0x3   :  { %s1769_s15 = smov 0  }
   0x4 LB: > { %s24_s16 = sadd.s32 1, %s1728_s12  ;;  %s27_s17 = sadd.s32 1, %s1732_s13  ;;  %s1740_s15 = sphi %s1769_s15, %s12_s15   ;;  %s1736_s14 = sphi %s1767_s14, %s2191_s14   ;;  %s1732_s13 = sphi %s1765_s13, %s2190_s13   ;;  %s1728_s12 = sphi %s1763_s12, %s2189_s12   ;;  %s1724_s11 = sphi %s1761_s11, %s2188_s11   ;;  %s1720_s10 = sphi %s1759_s10, %s2187_s10   ;;  %s1716_s9 = sphi %s1757_s9, %s2186_s9  }
   0x5   : > { %p25_p0 = scmp.ge.s32.totalorder %s24_s16, 3  ;;  %p1448_p1 = scmp.ge.s32.totalorder %s1740_s15, 1 }
   0x6   : > { %p153_p2 = scmp.lt.s32.totalorder %s1740_s15, 109  ;;  %s31_s18 = sadd.s32 1, %s1736_s14 }
   0x7   : > { %s2193_s16 = smov (%p25_p0, %s24_s16), 0  ;;  %s2195_s17 = smov (!%p25_p0, %s27_s17), %s1732_s13 }
   0x8   : > { %p154_p3 = pnand %p1448_p1, %p153_p2  ;;  %p29_p4 = scmp.ge.s32.totalorder %s2195_s17, 6 }
   0x9   : > { %p200_p6 = scmp.lt.s32.totalorder (!%p154_p3), %s1716_s9, 2  ;;  %s189_s19 = sadd.s32 (!%p154_p3), %s1716_s9, %s1720_s10 }
   0xa   : > { %s2197_s17 = smov (%p29_p4, %s2195_s17), 0  ;;  %s2199_s18 = smov (!%p29_p4, %s31_s18), %s1736_s14 }
   0xb   : > { %p33_p5 = scmp.ge.s32.totalorder %s2199_s18, 6  ;;  %157 = sbr.rel (%p154_p3) target bundleno = 345 (0x159), region = 28 }
   0xc   : > { %p190_p7 = scmp.lt.s32.totalorder (!%p154_p3), %s1724_s11, 5  ;;  %p192_p8 = scmp.lt.s32.totalorder (!%p154_p3), %s189_s19, 7 }
   0xd   : > { %s2201_s18 = smov (%p33_p5, %s2199_s18), 0  ;;  %p207_p9 = scmp.lt.s32.totalorder (!%p154_p3), %s1720_s10, 5 }
   0xe   : > { %p1609_p10 = scmp.ne.s32.totalorder (!%p154_p3), %s1716_s9, 0 }
  0x10   : > { %s201_s20 = scalar_select %p200_p6, %s1716_s9, 2  ;;  %vm357_vm0 = vcmask 1041408   ;;  %vm230_vm1 = vsmask.f32 3328  ;;  %vm231_vm2 = vsmask.f32 7440 }
  0x11   : > { %s2203_s11 = smov (!%p190_p7, %s1724_s11), 5  ;;  %s2205_s19 = smov (!%p192_p8, %s189_s19), 7  ;;  %vm344_vm3 = vcmask 31744   ;;  %vm1857_vm4 = vmor %vm230_vm1, %vm231_vm2  ;;  %vm471_vm5 = vcmask 1042432   ;;  %vm472_vm6 = vcmask 1046532  }
  0x12   : > { %s1627_s21 = smul.u32 18, %s201_s20  ;;  %s2207_s10 = smov (!%p207_p9, %s1720_s10), 5  ;;  %vm1920_vm7 = vmor %vm471_vm5, %vm472_vm6 }
  0x13   : > { %s1626_s25 = smul.u32 144, %s2203_s11 }
  0x14   : > { %s1813_s24 = scalar_lea.vmem %s2180_s1, %s1627_s21  ;;  %s1625_s26 = smul.u32 18, %s2205_s19 }
  0x15   : > { %v1452_v0 = vld [vmem:[%s1813_s24 + $0x2] sm:$0x3]  ;;  %s1629_s28 = smul.u32 42, %s2203_s11  ;;  %v1480_v2 = vld [vmem:[%s1813_s24 + $0x4] sm:$0x3] }
  0x16   : > { %v359_v1 = vsel %vm357_vm0, %v1452_v0, 0  ;;  %s196_s27 = sadd.s32 %s1626_s25, %s1625_s26  ;;  %v1492_v3 = vld [vmem:[%s1813_s24 + $0x6] sm:$0x3]  ;;  %s1628_s30 = smul.u32 7, %s2207_s10  ;;  %v528_v4 = vsel %vm357_vm0, %v1480_v2, 0 }
  0x17   : > { %368 = vmatpush.bf16.msra.mxu0 %v359_v1  ;;  %1622 = vmatpush.bf16.msra.mxu1 %v359_v1  ;;  %s1449_s29 = sshll.u32 %s196_s27, 2  ;;  %v606_v5 = vsel %vm357_vm0, %v1492_v3, 0  ;;  %v222_v6 = vld [vmem:[%s1813_s24] sm:$0x3] }
  0x18   : > { %1623 = vmatpush.bf16.msra.mxu2 %v359_v1  ;;  %1624 = vmatpush.bf16.msra.mxu3 %v359_v1  ;;  %s1828_s5 = scalar_lea.vmem %s2179_s0, %s1449_s29  ;;  %v420_v7 = vsel %vm357_vm0, %v222_v6, 0  ;;  %s211_s6 = sadd.s32 %s1629_s28, %s1628_s30 }
  0x19   : > { %v215_v8 = vld [vmem:[%s1828_s5] sm:$0xf]  ;;  %v216_v9 = vld [vmem:[%s1828_s5 + $0x8] sm:$0xf]  ;;  %v1834_v10 = vld [vmem:[%s1828_s5 + $0x4] sm:$0x1] }
  0x1a   : > { %s1451_s7 = sshll.u32 %s211_s6, 3  ;;  %v1837_v11 = vld [vmem:[%s1828_s5 + $0xc] sm:$0x1]  ;;  %v234_v12 = vshrl.u32 %v215_v8, 16  ;;  %v237_v13 = vshll.u32 %v215_v8, 16  ;;  %v243_v14 = vshll.u32 %v1834_v10, 16 }
  0x1b   : > { %429 = vmatpush.bf16.msrb.mxu1 %v420_v7  ;;  %s1843_s11 = scalar_lea.vmem %s2181_s2, %s1451_s7  ;;  %v248_v15 = vshrl.u32 %v216_v9, 16  ;;  %v251_v16 = vshll.u32 %v216_v9, 16  ;;  %v257_v17 = vshll.u32 %v1837_v11, 16  ;;  %v217_v18 = vld [vmem:[%s1828_s5 + $0x10] sm:$0xf] }
  0x1c   : > { %537 = vmatpush.bf16.msrb.mxu2 %v528_v4  ;;  %615 = vmatpush.bf16.msrb.mxu3 %v606_v5  ;;  %v236_v19 = vrot.slane %v234_v12, 4  ;;  %v239_v20 = vrot.slane %v237_v13, 5  ;;  %v245_v21 = vrot.slane %v243_v14, 5  ;;  %v218_v22 = vld [vmem:[%s1828_s5 + $0x18] sm:$0xf]  ;;  %v262_v27 = vshrl.u32 %v217_v18, 16 }
  0x1d   : > { %v250_v23 = vrot.slane %v248_v15, 4  ;;  %v253_v24 = vrot.slane %v251_v16, 5  ;;  %v259_v25 = vrot.slane %v257_v17, 5  ;;  %v1849_v26 = vld [vmem:[%s1828_s5 + $0x14] sm:$0x1]  ;;  %v265_v30 = vshll.u32 %v217_v18, 16 }
  0x1e   : > { %v240_v28 = vor.u32 %v239_v20, %v236_v19  ;;  %v1852_v29 = vld [vmem:[%s1828_s5 + $0x1c] sm:$0x1]  ;;  %v271_v31 = vshll.u32 %v1849_v26, 16  ;;  %v276_v32 = vshrl.u32 %v218_v22, 16  ;;  %v264_v35 = vrot.slane %v262_v27, 4 }
  0x1f   : > { %v254_v34 = vor.u32 %v253_v24, %v250_v23  ;;  %v279_v36 = vshll.u32 %v218_v22, 16  ;;  %v285_v37 = vshll.u32 %v1852_v29, 16  ;;  %v219_v38 = vld [vmem:[%s1828_s5 + $0x20] sm:$0xf]  ;;  %v267_v40 = vrot.slane %v265_v30, 5 }
  0x20   : > { %v241_v39 = vrot.slane %v240_v28, 4  ;;  %v273_v41 = vrot.slane %v271_v31, 5  ;;  %v278_v42 = vrot.slane %v276_v32, 4  ;;  %v1864_v46 = vld [vmem:[%s1828_s5 + $0x24] sm:$0x1]  ;;  %v290_v47 = vshrl.u32 %v219_v38, 16 }
  0x21   : > { %v255_v43 = vrot.slane %v254_v34, 4  ;;  %v281_v44 = vrot.slane %v279_v36, 5  ;;  %v287_v45 = vrot.slane %v285_v37, 5  ;;  %v268_v49 = vor.u32 %v267_v40, %v264_v35  ;;  %v220_v50 = vld [vmem:[%s1828_s5 + $0x28] sm:$0xf] }
  0x22   : > { %v246_v48 = vsel %vm1857_vm4, %v241_v39, %v245_v21  ;;  %v1870_v51 = vld [vmem:[%s1828_s5 + $0x2c] sm:$0x1]  ;;  %v293_v52 = vshll.u32 %v219_v38, 16  ;;  %v299_v53 = vshll.u32 %v1864_v46, 16  ;;  %v292_v57 = vrot.slane %v290_v47, 4 }
  0x23   : > { %v260_v54 = vsel %vm1857_vm4, %v255_v43, %v259_v25  ;;  %v333_v55 = vunpack.c.l.b16 %v246_v48  ;;  %v282_v56 = vor.u32 %v281_v44, %v278_v42  ;;  %v1876_v58 = vld [vmem:[%s1828_s5 + $0x30] sm:$0xf]  ;;  %v269_v60 = vrot.slane %v268_v49, 4  ;;  %v1882_v6 = vld [vmem:[%s1828_s5 + $0x34] sm:$0x1] }
  0x24   : > { %v334_v59 = vunpack.c.l.b16 %v260_v54  ;;  %v295_v61 = vrot.slane %v293_v52, 5  ;;  %v301_v62 = vrot.slane %v299_v53, 5  ;;  %v304_v0 = vshrl.u32 %v220_v50, 16  ;;  %v1523_v8 = vld [vmem:[%s1813_s24 + $0x8] sm:$0x3] }
  0x25   : > { %v283_v63 = vrot.slane %v282_v56, 4  ;;  %v307_v1 = vshll.u32 %v220_v50, 16  ;;  %v313_v2 = vshll.u32 %v1870_v51, 16  ;;  %v274_v4 = vsel %vm1857_vm4, %v269_v60, %v273_v41  ;;  %v1509_v25 = vld [vmem:[%s1828_s5 + $0x8] sm:$0xf] }
  0x26   : > { %v340_v3 = vpack.c.b16 %v334_v59, %v333_v55  ;;  %v296_v5 = vor.u32 %v295_v61, %v292_v57  ;;  %v318_v7 = vshrl.u32 %v1876_v58, 16  ;;  %v335_v12 = vunpack.c.l.b16 %v274_v4  ;;  %v1896_v30 = vld [vmem:[%s1828_s5 + $0xc] sm:$0x1]  ;;  %v450_v36 = vld [vmem:[%s1828_s5] sm:$0xe] }
  0x27   : > { %v288_v9 = vsel %vm1857_vm4, %v283_v63, %v287_v45  ;;  %v306_v13 = vrot.slane %v304_v0, 4  ;;  %v309_v14 = vrot.slane %v307_v1, 5  ;;  %v315_v17 = vrot.slane %v313_v2, 5  ;;  %v1511_v37 = vld [vmem:[%s1828_s5 + $0x10] sm:$0xf] }
  0x28   : > { %1453 = vmatmul.msk.bf16.vlgmr.msra.gmra.mxu0 %vm344_vm3, %v340_v3  ;;  %v336_v15 = vunpack.c.l.b16 %v288_v9  ;;  %v297_v16 = vrot.slane %v296_v5, 4  ;;  %v320_v18 = vrot.slane %v318_v7, 4  ;;  %v321_v20 = vshll.u32 %v1876_v58, 16  ;;  %v451_v41 = vld [vmem:[%s1828_s5 + $0x8] sm:$0xe] }
  0x29   : > { %v310_v19 = vor.u32 %v309_v14, %v306_v13  ;;  %v327_v21 = vshll.u32 %v1882_v6, 16  ;;  %v781_v22 = vsel %vm357_vm0, %v1523_v8, 0  ;;  %v658_v38 = vshrl.u32 %v1509_v25, 16  ;;  %v1905_v42 = vld [vmem:[%s1828_s5 + $0x14] sm:$0x1] }
  0x2a   : > { %v341_v23 = vpack.c.b16 %v336_v15, %v335_v12  ;;  %v302_v24 = vsel %vm1857_vm4, %v297_v16, %v301_v62  ;;  %790 = vmatpush.bf16.msrb.mxu0 %v781_v22  ;;  %v323_v28 = vrot.slane %v321_v20, 5  ;;  %v661_v39 = vshll.u32 %v1509_v25, 16  ;;  %v1554_v48 = vld [vmem:[%s1813_s24 + $0xc] sm:$0x3]  ;;  %v1585_v53 = vld [vmem:[%s1813_s24 + $0xe] sm:$0x3] }
  0x2b   : > { %v311_v27 = vrot.slane %v310_v19, 4  ;;  %v337_v31 = vunpack.c.l.b16 %v302_v24  ;;  %v329_v32 = vrot.slane %v327_v21, 5  ;;  %v667_v43 = vshll.u32 %v1896_v30, 16  ;;  %v1542_v59 = vld [vmem:[%s1813_s24 + $0xa] sm:$0x3] }
  0x2c   : > { %1454 = vmatmul.msk.bf16.vlgmr.msra.gmra.mxu1 %vm344_vm3, %v341_v23  ;;  %v324_v35 = vor.u32 %v323_v28, %v320_v18  ;;  %v476_v44 = vrot.slane %v1834_v10, 5  ;;  %v660_v47 = vrot.slane %v658_v38, 4  ;;  %v663_v50 = vrot.slane %v661_v39, 5  ;;  %v1604_v63 = vld [vmem:[%s1813_s24 + $0x10] sm:$0x3] }
  0x2d   : > { %v316_v34 = vsel %vm1857_vm4, %v311_v27, %v315_v17  ;;  %v672_v52 = vshrl.u32 %v1511_v37, 16  ;;  %v1473_v55 = vrot.slane %v450_v36, 9  ;;  %v675_v56 = vshll.u32 %v1511_v37, 16  ;;  %v1513_v12 = vld [vmem:[%s1828_s5 + $0x18] sm:$0xf] }
  0x2e   : > { %v338_v40 = vunpack.c.l.b16 %v316_v34  ;;  %v325_v45 = vrot.slane %v324_v35, 4  ;;  %v681_v57 = vshll.u32 %v1905_v42, 16  ;;  %v664_v60 = vor.u32 %v663_v50, %v660_v47  ;;  %v1613_v13 = vld [vmem:[%s1828_s5 + $0x4] sm:$0xf0]  ;;  %v1515_v21 = vld [vmem:[%s1828_s5 + $0x20] sm:$0xf] }
  0x2f   : > { %v669_v61 = vrot.slane %v667_v43, 5  ;;  %v674_v62 = vrot.slane %v672_v52, 4  ;;  %v480_v0 = vrot.slane %v1837_v11, 5  ;;  %v1474_v2 = vrot.slane %v451_v41, 9  ;;  %v1459_v11 = vld [vmem:[%s1828_s5] sm:$0xf] }
  0x30   : > { %v342_v49 = vpack.c.b16 %v338_v40, %v337_v31  ;;  %v330_v54 = vsel %vm1857_vm4, %v325_v45, %v329_v32  ;;  %v677_v3 = vrot.slane %v675_v56, 5  ;;  %v971_v4 = vsel %vm357_vm0, %v1554_v48, 0  ;;  %v1940_v25 = vld [vmem:[%s1828_s5 + $0x1c] sm:$0x1]  ;;  %v1943_v27 = vld [vmem:[%s1828_s5 + $0x24] sm:$0x1] }
  0x31   : > { %v339_v10 = vunpack.c.l.b16 %v330_v54  ;;  %v665_v7 = vrot.slane %v664_v60, 4  ;;  %v1146_v8 = vsel %vm357_vm0, %v1585_v53, 0  ;;  %v893_v9 = vsel %vm357_vm0, %v1542_v59, 0  ;;  %v1495_v47 = vld [vmem:[%s1828_s5 + $0x8] sm:$0xf] }
  0x32   : > { %1455 = vmatmul.msk.bf16.vlgmr.msra.gmra.mxu2 %vm344_vm3, %v342_v49  ;;  %v678_v14 = vor.u32 %v677_v3, %v674_v62  ;;  %v683_v15 = vrot.slane %v681_v57, 5  ;;  %902 = vmatpush.bf16.msra.mxu1 %v893_v9  ;;  %v1258_v16 = vsel %vm357_vm0, %v1604_v63, 0  ;;  %v477_v17 = vsel %vm1920_vm7, %v1473_v55, %v476_v44  ;;  %v1616_v50 = vld [vmem:[%s1828_s5 + $0xc] sm:$0xf0]  ;;  %v453_v53 = vld [vmem:[%s1828_s5 + $0x18] sm:$0xe] }
  0x33   : > { %v343_v5 = vpack.c.b16 %v339_v10, %v339_v10  ;;  %980 = vmatpush.bf16.msra.mxu2 %v971_v4  ;;  %v670_v18 = vsel %vm1857_vm4, %v665_v7, %v669_v61  ;;  %1267 = vmatpush.bf16.msra.mxu0 %v1258_v16  ;;  %v481_v19 = vsel %vm1920_vm7, %v1474_v2, %v480_v0  ;;  %v686_v22 = vshrl.u32 %v1513_v12, 16  ;;  %v452_v52 = vld [vmem:[%s1828_s5 + $0x10] sm:$0xe]  ;;  %v1517_v59 = vld [vmem:[%s1828_s5 + $0x28] sm:$0xf] }
  0x34   : > { %v679_v20 = vrot.slane %v678_v14, 4  ;;  %v1460_v23 = vor.u32 %v1613_v13, %v1459_v11  ;;  %v757_v24 = vunpack.c.l.b16 %v670_v18  ;;  %v689_v28 = vshll.u32 %v1513_v12, 16  ;;  %v1519_v10 = vld [vmem:[%s1828_s5 + $0x30] sm:$0xf]  ;;  %v1614_v11 = vld [vmem:[%s1828_s5 + $0x14] sm:$0xf0] }
  0x35   : > { %1456 = vmatmul.msk.bf16.vlgmr.msra.gmra.mxu3 %vm344_vm3, %v343_v5  ;;  %v504_v31 = vunpack.c.l.b16 %v477_v17  ;;  %v688_v34 = vrot.slane %v686_v22, 4  ;;  %v505_v35 = vunpack.c.l.b16 %v481_v19  ;;  %v700_v38 = vshrl.u32 %v1515_v21, 16  ;;  %v1463_v12 = vld [vmem:[%s1828_s5 + $0x10] sm:$0xf] }
  0x36   : > { %1155 = vmatpush.bf16.msra.mxu3 %v1146_v8  ;;  %v684_v32 = vsel %vm1857_vm4, %v679_v20, %v683_v15  ;;  %v691_v37 = vrot.slane %v689_v28, 5  ;;  %v695_v39 = vshll.u32 %v1940_v25, 16  ;;  %v703_v40 = vshll.u32 %v1515_v21, 16  ;;  %v1972_v20 = vld [vmem:[%s1828_s5 + $0x2c] sm:$0x1] }
  0x37   : > { %v758_v36 = vunpack.c.l.b16 %v684_v32  ;;  %v709_v41 = vshll.u32 %v1943_v27, 16  ;;  %v702_v45 = vrot.slane %v700_v38, 4  ;;  %v511_v49 = vpack.c.b16 %v505_v35, %v504_v31  ;;  %v1975_v21 = vld [vmem:[%s1828_s5 + $0x34] sm:$0x1]  ;;  %v454_v38 = vld [vmem:[%s1828_s5 + $0x20] sm:$0xe] }
  0x38   : > { %v692_v44 = vor.u32 %v691_v37, %v688_v34  ;;  %v705_v48 = vrot.slane %v703_v40, 5  ;;  %v697_v55 = vrot.slane %v695_v39, 5  ;;  %v1496_v60 = vor.u32 %v1616_v50, %v1495_v47  ;;  %v1617_v37 = vld [vmem:[%s1828_s5 + $0x1c] sm:$0xf0]  ;;  %v455_v39 = vld [vmem:[%s1828_s5 + $0x28] sm:$0xe] }
  0x39   : > { %v764_v43 = vpack.c.b16 %v758_v36, %v757_v24  ;;  %v711_v57 = vrot.slane %v709_v41, 5  ;;  %v1475_v61 = vrot.slane %v452_v52, 9  ;;  %v484_v63 = vrot.slane %v1849_v26, 5  ;;  %v1499_v36 = vld [vmem:[%s1828_s5 + $0x18] sm:$0xf] }
  0x3a   : > { %v693_v54 = vrot.slane %v692_v44, 4  ;;  %v706_v56 = vor.u32 %v705_v48, %v702_v45  ;;  %v1476_v0 = vrot.slane %v453_v53, 9  ;;  %v488_v2 = vrot.slane %v1852_v29, 5  ;;  %v1521_v45 = vld [vmem:[%s1828_s5 + $0x38] sm:$0xf] }
  0x3b   : > { %1524 = vmatmul.msk.bf16.vlgmr.msrb.gmra.mxu0 %vm344_vm3, %v764_v43  ;;  %v714_v3 = vshrl.u32 %v1517_v59, 16  ;;  %v717_v7 = vshll.u32 %v1517_v59, 16  ;;  %v728_v8 = vshrl.u32 %v1519_v10, 16  ;;  %v731_v9 = vshll.u32 %v1519_v10, 16  ;;  %v1467_v10 = vld [vmem:[%s1828_s5 + $0x20] sm:$0xf] }
  0x3c   : > { %1469 = vmatmul.msk.bf16.vlgmr.msrb.gmra.mxu1 %vm344_vm3, %v1460_v23  ;;  %v707_v62 = vrot.slane %v706_v56, 4  ;;  %v698_v4 = vsel %vm1857_vm4, %v693_v54, %v697_v55  ;;  %v485_v26 = vsel %vm1920_vm7, %v1475_v61, %v484_v63  ;;  %v489_v29 = vsel %vm1920_vm7, %v1476_v0, %v488_v2  ;;  %v1528_v63 = vld [vmem:[%s1828_s5 + $0x8] sm:$0xe]  ;;  %v1529_v0 = vld [vmem:[%s1828_s5 + $0x10] sm:$0xe] }
  0x3d   : > { %v759_v13 = vunpack.c.l.b16 %v698_v4  ;;  %v716_v15 = vrot.slane %v714_v3, 4  ;;  %v719_v16 = vrot.slane %v717_v7, 5  ;;  %v730_v17 = vrot.slane %v728_v8, 4 }
  0x3e   : > { %v712_v5 = vsel %vm1857_vm4, %v707_v62, %v711_v57  ;;  %v733_v18 = vrot.slane %v731_v9, 5  ;;  %v1464_v19 = vor.u32 %v1614_v11, %v1463_v12  ;;  %v506_v22 = vunpack.c.l.b16 %v485_v26 }
  0x3f   : > { %v760_v14 = vunpack.c.l.b16 %v712_v5  ;;  %v507_v23 = vunpack.c.l.b16 %v489_v29  ;;  %v720_v28 = vor.u32 %v719_v16, %v716_v15  ;;  %v723_v31 = vshll.u32 %v1972_v20, 16  ;;  %v2005_v5 = vld [vmem:[%s1828_s5 + $0x3c] sm:$0x1] }
  0x40   : > { %v734_v32 = vor.u32 %v733_v18, %v730_v17  ;;  %v737_v34 = vshll.u32 %v1975_v21, 16  ;;  %v1500_v47 = vor.u32 %v1617_v37, %v1499_v36  ;;  %v1477_v48 = vrot.slane %v454_v38, 9  ;;  %v1503_v17 = vld [vmem:[%s1828_s5 + $0x28] sm:$0xf]  ;;  %v1618_v18 = vld [vmem:[%s1828_s5 + $0x2c] sm:$0xf0] }
  0x41   : > { %v765_v24 = vpack.c.b16 %v760_v14, %v759_v13  ;;  %v512_v35 = vpack.c.b16 %v507_v23, %v506_v22  ;;  %v721_v40 = vrot.slane %v720_v28, 4  ;;  %v725_v41 = vrot.slane %v723_v31, 5  ;;  %v456_v23 = vld [vmem:[%s1828_s5 + $0x30] sm:$0xe]  ;;  %v1530_v37 = vld [vmem:[%s1828_s5 + $0x18] sm:$0xe] }
  0x42   : > { %1481 = vmatmul.msk.bf16.vlgmr.msrb.gmra.mxu2 %vm344_vm3, %v511_v49  ;;  %v735_v43 = vrot.slane %v734_v32, 4  ;;  %v739_v44 = vrot.slane %v737_v34, 5  ;;  %v492_v49 = vrot.slane %v1864_v46, 5  ;;  %v1478_v50 = vrot.slane %v455_v39, 9  ;;  %v1615_v46 = vld [vmem:[%s1828_s5 + $0x24] sm:$0xf0] }
  0x43   : > { %v496_v52 = vrot.slane %v1870_v51, 5  ;;  %v726_v53 = vsel %vm1857_vm4, %v721_v40, %v725_v41  ;;  %v742_v55 = vshrl.u32 %v1521_v45, 16  ;;  %v745_v56 = vshll.u32 %v1521_v45, 16  ;;  %v1531_v38 = vld [vmem:[%s1828_s5 + $0x20] sm:$0xe] }
  0x44   : > { %v740_v54 = vsel %vm1857_vm4, %v735_v43, %v739_v44  ;;  %v841_v57 = vrot.slane %v1896_v30, 5  ;;  %v845_v59 = vrot.slane %v1905_v42, 5  ;;  %v493_v51 = vsel %vm1920_vm7, %v1477_v48, %v492_v49 }
  0x45   : > { %1505 = vmatmul.msk.bf16.vlgmr.msrb.gmra.mxu3 %vm344_vm3, %v1496_v60  ;;  %v497_v60 = vsel %vm1920_vm7, %v1478_v50, %v496_v52  ;;  %v761_v61 = vunpack.c.l.b16 %v726_v53  ;;  %v762_v62 = vunpack.c.l.b16 %v740_v54  ;;  %v744_v2 = vrot.slane %v742_v55, 4  ;;  %v1590_v50 = vld [vmem:[%s1828_s5 + $0x10] sm:$0xe]  ;;  %v1591_v52 = vld [vmem:[%s1828_s5 + $0x18] sm:$0xe] }
  0x46   : > { %v747_v3 = vrot.slane %v745_v56, 5  ;;  %v1535_v30 = vrot.slane %v1528_v63, 9  ;;  %v1536_v4 = vrot.slane %v1529_v0, 9  ;;  %v1468_v42 = vor.u32 %v1615_v46, %v1467_v10  ;;  %v1491_v55 = vld [vmem:[%s1828_s5 + $0x38] sm:$0xf] }
  0x47   : > { %v508_v7 = vunpack.c.l.b16 %v493_v51  ;;  %v509_v12 = vunpack.c.l.b16 %v497_v60  ;;  %v766_v11 = vpack.c.b16 %v762_v62, %v761_v61  ;;  %v751_v14 = vshll.u32 %v2005_v5, 16  ;;  %v1574_v10 = vld [vmem:[%s1828_s5 + $0x1c] sm:$0x1] }
  0x48   : > { %v842_v8 = vsel %vm1920_vm7, %v1535_v30, %v841_v57  ;;  %v846_v9 = vsel %vm1920_vm7, %v1536_v4, %v845_v59  ;;  %v748_v13 = vor.u32 %v747_v3, %v744_v2  ;;  %v1479_v28 = vrot.slane %v456_v23, 9  ;;  %v1572_v59 = vld [vmem:[%s1828_s5 + $0x14] sm:$0x1] }
  0x49   : > { %v869_v26 = vunpack.c.l.b16 %v842_v8  ;;  %v870_v29 = vunpack.c.l.b16 %v846_v9  ;;  %v513_v16 = vpack.c.b16 %v509_v12, %v508_v7  ;;  %v753_v22 = vrot.slane %v751_v14, 5 }
  0x4a   : > { %v500_v31 = vrot.slane %v1882_v6, 5  ;;  %v402_v34 = vunpack.c.l.b16 %v1876_v58  ;;  %v849_v39 = vrot.slane %v1940_v25, 5  ;;  %v853_v40 = vrot.slane %v1943_v27, 5  ;;  %v1573_v58 = vld [vmem:[%s1828_s5 + $0x18] sm:$0xf] }
  0x4b   : > { %1525 = vmatmul.msk.bf16.gmra.mxu0 %vm344_vm3, %v765_v24  ;;  %v2013_v15 = vpack.c.b16 %v870_v29, %v869_v26  ;;  %v1504_v24 = vor.u32 %v1618_v18, %v1503_v17  ;;  %v1537_v41 = vrot.slane %v1530_v37, 9  ;;  %v1538_v43 = vrot.slane %v1531_v38, 9  ;;  %v1575_v17 = vld [vmem:[%s1828_s5 + $0x20] sm:$0xf]  ;;  %v1532_v18 = vld [vmem:[%s1828_s5 + $0x28] sm:$0xe] }
  0x4c   : > { %1470 = vmatmul.msk.bf16.gmra.mxu1 %vm344_vm3, %v1464_v19  ;;  %v749_v19 = vrot.slane %v748_v13, 4  ;;  %v501_v6 = vsel %vm1920_vm7, %v1479_v28, %v500_v31  ;;  %v406_v44 = vpack.c.b16 %v402_v34, %v402_v34  ;;  %v1037_v56 = vshrl.u32 %v1573_v58, 16  ;;  %v1577_v31 = vld [vmem:[%s1828_s5 + $0x28] sm:$0xf] }
  0x4d   : > { %v850_v48 = vsel %vm1920_vm7, %v1537_v41, %v849_v39  ;;  %v854_v25 = vsel %vm1920_vm7, %v1538_v43, %v853_v40  ;;  %v510_v49 = vunpack.c.l.b16 %v501_v6  ;;  %v1040_v57 = vshll.u32 %v1573_v58, 16  ;;  %v1557_v40 = vld [vmem:[%s1828_s5 + $0x10] sm:$0xf] }
  0x4e   : > { %v754_v32 = vsel %vm1857_vm4, %v749_v19, %v753_v22  ;;  %v871_v53 = vunpack.c.l.b16 %v850_v48  ;;  %v872_v54 = vunpack.c.l.b16 %v854_v25  ;;  %v1597_v61 = vrot.slane %v1590_v50, 9  ;;  %v1533_v19 = vld [vmem:[%s1828_s5 + $0x30] sm:$0xe] }
  0x4f   : > { %v763_v36 = vunpack.c.l.b16 %v754_v32  ;;  %v1206_v62 = vrot.slane %v1572_v59, 5  ;;  %v1598_v63 = vrot.slane %v1591_v52, 9  ;;  %v1210_v0 = vrot.slane %v1574_v10, 5 }
  0x50   : > { %v2043_v60 = vpack.c.b16 %v872_v54, %v871_v53  ;;  %v514_v2 = vpack.c.b16 %v510_v49, %v510_v49  ;;  %v588_v3 = vunpack.c.l.b16 %v1491_v55  ;;  %v1039_v30 = vrot.slane %v1037_v56, 4  ;;  %v1576_v53 = vld [vmem:[%s1828_s5 + $0x24] sm:$0x1]  ;;  %v1578_v54 = vld [vmem:[%s1828_s5 + $0x2c] sm:$0x1] }
  0x51   : > { %v767_v27 = vpack.c.b16 %v763_v36, %v763_v36  ;;  %v1042_v4 = vrot.slane %v1040_v57, 5  ;;  %v1032_v7 = vshll.u32 %v1572_v59, 16  ;;  %v1207_v8 = vsel %vm1920_vm7, %v1597_v61, %v1206_v62 }
  0x52   : > { %1482 = vmatmul.msk.bf16.gmra.mxu2 %vm344_vm3, %v512_v35  ;;  %v1571_v35 = vld [vmem:[%s1828_s5 + $0x10] sm:$0xf]  ;;  %v1211_v9 = vsel %vm1920_vm7, %v1598_v63, %v1210_v0  ;;  %v592_v12 = vpack.c.b16 %v588_v3, %v588_v3  ;;  %v1046_v26 = vshll.u32 %v1574_v10, 16  ;;  %v1234_v29 = vunpack.c.l.b16 %v1207_v8 }
  0x53   : > { %v1023_v45 = vshrl.u32 %v1571_v35, 16  ;;  %v1235_v13 = vunpack.c.l.b16 %v1211_v9  ;;  %v857_v22 = vrot.slane %v1972_v20, 5  ;;  %v861_v23 = vrot.slane %v1975_v21, 5  ;;  %v1619_v20 = vld [vmem:[%s1828_s5 + $0x14] sm:$0xf0] }
  0x54   : > { %v1048_v28 = vrot.slane %v1046_v26, 5  ;;  %v1539_v32 = vrot.slane %v1532_v18, 9  ;;  %v1540_v34 = vrot.slane %v1533_v19, 9  ;;  %v1051_v36 = vshrl.u32 %v1575_v17, 16 }
  0x55   : > { %1506 = vmatmul.msk.bf16.gmra.mxu3 %vm344_vm3, %v1500_v47  ;;  %v1026_v47 = vshll.u32 %v1571_v35, 16  ;;  %v1025_v46 = vrot.slane %v1023_v45, 4  ;;  %v1241_v35 = vpack.c.b16 %v1235_v13, %v1234_v29  ;;  %v1054_v37 = vshll.u32 %v1575_v17, 16  ;;  %v1592_v45 = vld [vmem:[%s1828_s5 + $0x20] sm:$0xe] }
  0x56   : > { %v858_v38 = vsel %vm1920_vm7, %v1539_v32, %v857_v22  ;;  %v862_v39 = vsel %vm1920_vm7, %v1540_v34, %v861_v23  ;;  %v1065_v6 = vshrl.u32 %v1577_v31, 16  ;;  %v1068_v21 = vshll.u32 %v1577_v31, 16  ;;  %v1561_v29 = vld [vmem:[%s1828_s5 + $0x20] sm:$0xf]  ;;  %v1620_v13 = vld [vmem:[%s1828_s5 + $0x24] sm:$0xf0] }
  0x57   : > { %v1028_v51 = vrot.slane %v1026_v47, 5  ;;  %v873_v41 = vunpack.c.l.b16 %v858_v38  ;;  %v874_v43 = vunpack.c.l.b16 %v862_v39  ;;  %v1593_v47 = vld [vmem:[%s1828_s5 + $0x28] sm:$0xe]  ;;  %v1558_v25 = vor.u32 %v1619_v20, %v1557_v40  ;;  %v1594_v22 = vld [vmem:[%s1828_s5 + $0x30] sm:$0xe] }
  0x58   : > { %v1053_v49 = vrot.slane %v1051_v36, 4  ;;  %v1067_v55 = vrot.slane %v1065_v6, 4  ;;  %v1070_v56 = vrot.slane %v1068_v21, 5  ;;  %v1599_v57 = vrot.slane %v1592_v45, 9  ;;  %v1595_v23 = vld [vmem:[%s1828_s5 + $0x38] sm:$0xe] }
  0x59   : > { %v2072_v48 = vpack.c.b16 %v874_v43, %v873_v41  ;;  %v1214_v59 = vrot.slane %v1576_v53, 5  ;;  %v1600_v10 = vrot.slane %v1593_v47, 9  ;;  %v1060_v61 = vshll.u32 %v1576_v53, 16  ;;  %v1582_v36 = vld [vmem:[%s1828_s5 + $0x3c] sm:$0x1] }
  0x5a   : > { %v1071_v62 = vor.u32 %v1070_v56, %v1067_v55  ;;  %v1074_v63 = vshll.u32 %v1578_v54, 16  ;;  %v1601_v39 = vrot.slane %v1594_v22, 9  ;;  %v1602_v20 = vrot.slane %v1595_v23, 9  ;;  %v1583_v53 = vld [vmem:[%s1828_s5 + $0x40] sm:$0xf] }
  0x5b   : > { %1526 = vmatmul.msk.bf16.gmra.mxu0 %vm344_vm3, %v766_v11  ;;  %v1043_v11 = vor.u32 %v1042_v4, %v1039_v30  ;;  %v1215_v0 = vsel %vm1920_vm7, %v1599_v57, %v1214_v59  ;;  %v1579_v4 = vld [vmem:[%s1828_s5 + $0x30] sm:$0xf]  ;;  %v1226_v6 = vrot.slane %v1582_v36, 5  ;;  %v1534_v55 = vld [vmem:[%s1828_s5 + $0x38] sm:$0xe] }
  0x5c   : > { %1471 = vmatmul.msk.bf16.gmra.mxu1 %vm344_vm3, %v1468_v42  ;;  %v1029_v42 = vor.u32 %v1028_v51, %v1025_v46  ;;  %v1236_v3 = vunpack.c.l.b16 %v1215_v0  ;;  %v1072_v8 = vrot.slane %v1071_v62, 4  ;;  %v1076_v9 = vrot.slane %v1074_v63, 5  ;;  %v1565_v56 = vld [vmem:[%s1828_s5 + $0x30] sm:$0xf]  ;;  %v1621_v57 = vld [vmem:[%s1828_s5 + $0x34] sm:$0xf0] }
  0x5d   : > { %v1082_v26 = vshll.u32 %v1579_v4, 16  ;;  %v1227_v45 = vsel %vm1920_vm7, %v1602_v20, %v1226_v6  ;;  %v865_v62 = vrot.slane %v2005_v5, 5  ;;  %v1566_v63 = vor.u32 %v1621_v57, %v1565_v56 }
  0x5e   : > { %v1030_v14 = vrot.slane %v1029_v42, 4  ;;  %v1077_v19 = vsel %vm1857_vm4, %v1072_v8, %v1076_v9 }
  0x5f   : > { %v1084_v31 = vrot.slane %v1082_v26, 5  ;;  %v1125_v34 = vunpack.c.l.b16 %v1077_v19 }
  0x62   : > { %1483 = vmatmul.msk.bf16.gmra.mxu2 %vm344_vm3, %v513_v16  ;;  %v1034_v16 = vrot.slane %v1032_v7, 5  ;;  %v1062_v7 = vrot.slane %v1060_v61, 5  ;;  %v1541_v61 = vrot.slane %v1534_v55, 9 }
  0x64   : > { %v866_v8 = vsel %vm1920_vm7, %v1541_v61, %v865_v62 }
  0x65   : > { %1507 = vmatmul.msk.bf16.gmra.mxu3 %vm344_vm3, %v1504_v24  ;;  %v1044_v24 = vrot.slane %v1043_v11, 4  ;;  %v1079_v11 = vshrl.u32 %v1579_v4, 16 }
  0x67   : > { %v1049_v58 = vsel %vm1857_vm4, %v1044_v24, %v1048_v28  ;;  %v1562_v24 = vor.u32 %v1620_v13, %v1561_v29  ;;  %v1081_v28 = vrot.slane %v1079_v11, 4  ;;  %v875_v11 = vunpack.c.l.b16 %v866_v8  ;;  %v1553_v13 = vld [vmem:[%s1828_s5 + $0x40] sm:$0xf] }
  0x68   : > { %v1123_v52 = vunpack.c.l.b16 %v1049_v58  ;;  %v953_v19 = vunpack.c.l.b16 %v1553_v13 }
  0x69   : > { %v1085_v21 = vor.u32 %v1084_v31, %v1081_v28 }
  0x6b   : > { %1527 = vmatmul.msk.bf16.gmra.mxu0 %vm344_vm3, %v767_v27  ;;  %v1056_v27 = vrot.slane %v1054_v37, 5 }
  0x6c   : > { %1472 = vmatmul.msk.bf16.gmra.mxu1 %vm344_vm3, %v406_v44  ;;  %v1035_v44 = vsel %vm1857_vm4, %v1030_v14, %v1034_v16 }
  0x6d   : > { %v1122_v50 = vunpack.c.l.b16 %v1035_v44  ;;  %v1057_v51 = vor.u32 %v1056_v27, %v1053_v49  ;;  %v1102_v44 = vshll.u32 %v1582_v36, 16  ;;  %v1086_v49 = vrot.slane %v1085_v21, 4 }
  0x6f   : > { %v1129_v46 = vpack.c.b16 %v1123_v52, %v1122_v50  ;;  %v1058_v42 = vrot.slane %v1057_v51, 4  ;;  %v1104_v52 = vrot.slane %v1102_v44, 5  ;;  %v1596_v51 = vld [vmem:[%s1828_s5 + $0x40] sm:$0xe] }
  0x71   : > { %v1063_v18 = vsel %vm1857_vm4, %v1058_v42, %v1062_v7  ;;  %v1603_v42 = vrot.slane %v1596_v51, 9 }
  0x72   : > { %1484 = vmatmul.msk.bf16.gmra.mxu2 %vm344_vm3, %v514_v2  ;;  %v1124_v32 = vunpack.c.l.b16 %v1063_v18 }
  0x75   : > { %1508 = vmatmul.msk.bf16.gmra.mxu3 %vm344_vm3, %v592_v12  ;;  %v1581_v12 = vld [vmem:[%s1828_s5 + $0x38] sm:$0xf] }
  0x76   : > { %v1093_v16 = vshrl.u32 %v1581_v12, 16  ;;  %v1096_v17 = vshll.u32 %v1581_v12, 16 }
  0x78   : > { %v1095_v37 = vrot.slane %v1093_v16, 4  ;;  %v1098_v38 = vrot.slane %v1096_v17, 5  ;;  %v879_v17 = vpack.c.b16 %v875_v11, %v875_v11 }
  0x7a   : > { %v1099_v43 = vor.u32 %v1098_v38, %v1095_v37 }
  0x7b   : > { %1605 = vmatmul.msk.bf16.vlgmr.msra.gmra.mxu0 %vm344_vm3, %v1241_v35  ;;  %v1580_v35 = vld [vmem:[%s1828_s5 + $0x34] sm:$0x1] }
  0x7c   : > { %1543 = vmatmul.msk.bf16.vlgmr.msra.gmra.mxu1 %vm344_vm3, %v2013_v15  ;;  %v1218_v15 = vrot.slane %v1578_v54, 5  ;;  %v1222_v40 = vrot.slane %v1580_v35, 5  ;;  %v1088_v41 = vshll.u32 %v1580_v35, 16  ;;  %v1100_v50 = vrot.slane %v1099_v43, 4 }
  0x7e   : > { %v1219_v2 = vsel %vm1920_vm7, %v1600_v10, %v1218_v15  ;;  %v1223_v58 = vsel %vm1920_vm7, %v1601_v39, %v1222_v40  ;;  %v1090_v27 = vrot.slane %v1088_v41, 5  ;;  %v1105_v10 = vsel %vm1857_vm4, %v1100_v50, %v1104_v52 }
  0x7f   : > { %v1237_v30 = vunpack.c.l.b16 %v1219_v2  ;;  %v1238_v47 = vunpack.c.l.b16 %v1223_v58  ;;  %v1107_v15 = vshrl.u32 %v1583_v53, 16  ;;  %v1127_v2 = vunpack.c.l.b16 %v1105_v10 }
  0x80   : > { %v1091_v59 = vsel %vm1857_vm4, %v1086_v49, %v1090_v27 }
  0x81   : > { %v1242_v14 = vpack.c.b16 %v1237_v30, %v1236_v3  ;;  %v1126_v0 = vunpack.c.l.b16 %v1091_v59  ;;  %v1584_v3 = vld [vmem:[%s1828_s5 + $0x44] sm:$0x1]  ;;  %v1109_v30 = vrot.slane %v1107_v15, 4 }
  0x82   : > { %1567 = vmatmul.msk.bf16.vlgmr.msra.gmra.mxu2 %vm344_vm3, %v1558_v25  ;;  %v1239_v25 = vunpack.c.l.b16 %v1227_v45  ;;  %v1230_v7 = vrot.slane %v1584_v3, 5  ;;  %v1116_v12 = vshll.u32 %v1584_v3, 16 }
  0x84   : > { %v1243_v54 = vpack.c.b16 %v1239_v25, %v1238_v47  ;;  %v1231_v5 = vsel %vm1920_vm7, %v1603_v42, %v1230_v7  ;;  %v1118_v16 = vrot.slane %v1116_v12, 5 }
  0x85   : > { %1586 = vmatmul.msk.bf16.vlgmr.msra.gmra.mxu3 %vm344_vm3, %v1129_v46  ;;  %v1110_v46 = vshll.u32 %v1583_v53, 16  ;;  %v1240_v26 = vunpack.c.l.b16 %v1231_v5 }
  0x87   : > { %v1112_v4 = vrot.slane %v1110_v46, 5  ;;  %v1244_v22 = vpack.c.b16 %v1240_v26, %v1240_v26 }
  0x89   : > { %v1113_v9 = vor.u32 %v1112_v4, %v1109_v30 }
  0x8b   : > { %1606 = vmatmul.msk.bf16.gmra.mxu0 %vm344_vm3, %v1242_v14  ;;  %v1114_v14 = vrot.slane %v1113_v9, 4 }
  0x8c   : > { %1544 = vmatmul.msk.bf16.gmra.mxu1 %vm344_vm3, %v2043_v60  ;;  %v1130_v60 = vpack.c.b16 %v1125_v34, %v1124_v32 }
  0x8d   : > { %v1119_v23 = vsel %vm1857_vm4, %v1114_v14, %v1118_v16 }
  0x8e   : > { %v1128_v1 = vunpack.c.l.b16 %v1119_v23 }
  0x90   : > { %v1132_v32 = vpack.c.b16 %v1128_v1, %v1128_v1 }
  0x92   : > { %1568 = vmatmul.msk.bf16.gmra.mxu2 %vm344_vm3, %v1562_v24  ;;  %v957_v24 = vpack.c.b16 %v953_v19, %v953_v19 }
  0x95   : > { %1587 = vmatmul.msk.bf16.gmra.mxu3 %vm344_vm3, %v1130_v60 }
  0x9b   : > { %1607 = vmatmul.msk.bf16.gmra.mxu0 %vm344_vm3, %v1243_v54 }
  0x9c   : > { %1545 = vmatmul.msk.bf16.gmra.mxu1 %vm344_vm3, %v2072_v48  ;;  %v1131_v48 = vpack.c.b16 %v1127_v2, %v1126_v0 }
  0xa2   : > { %1569 = vmatmul.msk.bf16.gmra.mxu2 %vm344_vm3, %v1566_v63 }
  0xa5   : > { %1588 = vmatmul.msk.bf16.gmra.mxu3 %vm344_vm3, %v1131_v48  ;;  %v370_v29 = vpop.f32.mrf.mxu0 }
  0xa9   : > { %v375_v18 = vpop.f32.mrf.mxu1 }
  0xab   : > { %1608 = vmatmul.msk.bf16.gmra.mxu0 %vm344_vm3, %v1244_v22 }
  0xac   : > { %1546 = vmatmul.msk.bf16.gmra.mxu1 %vm344_vm3, %v879_v17 }
  0xad   : > { %v372_v28 = vpop.f32.mrf.mxu0 }
  0xb1   : > { %v377_v31 = vpop.f32.mrf.mxu1 }
  0xb2   : > { %1570 = vmatmul.msk.bf16.gmra.mxu2 %vm344_vm3, %v957_v24 }
  0xb5   : > { %v380_v34 = vpop.f32.mrf.mxu2  ;;  %1589 = vmatmul.msk.bf16.gmra.mxu3 %vm344_vm3, %v1132_v32 }
  0xb8   : > { %v385_v35 = vpop.f32.mrf.mxu3  ;;  %v792_v38 = vpop.f32.mrf.mxu0 }
  0xb9   : > { %v431_v36 = vpop.f32.mrf.mxu1 }
  0xba   : > { %v432_v37 = vadd.f32 %v431_v36, %v370_v29 }
  0xbd   : > { %v382_v33 = vpop.f32.mrf.mxu2 }
  0xc0   : > { %v387_v39 = vpop.f32.mrf.mxu3  ;;  %v794_v6 = vpop.f32.mrf.mxu0 }
  0xc1   : > { %v433_v40 = vpop.f32.mrf.mxu1 }
  0xc2   : > { %v434_v20 = vadd.f32 %v433_v40, %v372_v28 }
  0xc5   : > { %v539_v60 = vpop.f32.mrf.mxu2 }
  0xc6   : > { %v558_v21 = vadd.f32 %v539_v60, %v432_v37 }
  0xc8   : > { %v617_v41 = vpop.f32.mrf.mxu3  ;;  %v797_v45 = vpop.f32.mrf.mxu0 }
  0xc9   : > { %v436_v43 = vpop.f32.mrf.mxu1  ;;  %v636_v44 = vadd.f32 %v617_v41, %v558_v21 }
  0xca   : > { %v437_v58 = vadd.f32 %v436_v43, %v375_v18 }
  0xcb   : > { %v811_v47 = vadd.f32 %v792_v38, %v636_v44 }
  0xcd   : > { %v541_v25 = vpop.f32.mrf.mxu2 }
  0xce   : > { %v559_v49 = vadd.f32 %v541_v25, %v434_v20 }
  0xd0   : > { %v619_v27 = vpop.f32.mrf.mxu3  ;;  %v799_v54 = vpop.f32.mrf.mxu0 }
  0xd1   : > { %v438_v50 = vpop.f32.mrf.mxu1  ;;  %v637_v52 = vadd.f32 %v619_v27, %v559_v49 }
  0xd2   : > { %v439_v53 = vadd.f32 %v438_v50, %v377_v31 }
  0xd3   : > { %v812_v55 = vadd.f32 %v794_v6, %v637_v52 }
  0xd5   : > { %v544_v56 = vpop.f32.mrf.mxu2 }
  0xd6   : > { %v560_v57 = vadd.f32 %v544_v56, %v437_v58 }
  0xd8   : > { %v622_v59 = vpop.f32.mrf.mxu3  ;;  %v802_v51 = vpop.f32.mrf.mxu0 }
  0xd9   : > { %v441_v10 = vpop.f32.mrf.mxu1  ;;  %v638_v15 = vadd.f32 %v622_v59, %v560_v57 }
  0xda   : > { %v442_v46 = vadd.f32 %v441_v10, %v380_v34 }
  0xdb   : > { %v813_v61 = vadd.f32 %v797_v45, %v638_v15 }
  0xdd   : > { %v546_v62 = vpop.f32.mrf.mxu2 }
  0xde   : > { %v561_v63 = vadd.f32 %v546_v62, %v439_v53 }
  0xe0   : > { %v624_v0 = vpop.f32.mrf.mxu3  ;;  %v804_v4 = vpop.f32.mrf.mxu0 }
  0xe1   : > { %v443_v2 = vpop.f32.mrf.mxu1  ;;  %v639_v3 = vadd.f32 %v624_v0, %v561_v63 }
  0xe2   : > { %v444_v30 = vadd.f32 %v443_v2, %v382_v33 }
  0xe3   : > { %v814_v42 = vadd.f32 %v799_v54, %v639_v3 }
  0xe5   : > { %v549_v7 = vpop.f32.mrf.mxu2 }
  0xe6   : > { %v562_v8 = vadd.f32 %v549_v7, %v442_v46 }
  0xe8   : > { %v627_v48 = vpop.f32.mrf.mxu3  ;;  %v807_v11 = vpop.f32.mrf.mxu0 }
  0xe9   : > { %v446_v9 = vpop.f32.mrf.mxu1  ;;  %v640_v12 = vadd.f32 %v627_v48, %v562_v8 }
  0xea   : > { %v447_v5 = vadd.f32 %v446_v9, %v385_v35 }
  0xeb   : > { %v815_v26 = vadd.f32 %v802_v51, %v640_v12 }
  0xed   : > { %v551_v29 = vpop.f32.mrf.mxu2 }
  0xee   : > { %v563_v13 = vadd.f32 %v551_v29, %v444_v30 }
  0xf0   : > { %v629_v14 = vpop.f32.mrf.mxu3  ;;  %v809_v18 = vpop.f32.mrf.mxu0 }
  0xf1   : > { %v448_v16 = vpop.f32.mrf.mxu1  ;;  %v641_v17 = vadd.f32 %v629_v14, %v563_v13 }
  0xf3   : > { %v816_v19 = vadd.f32 %v804_v4, %v641_v17 }
  0xf5   : > { %v554_v22 = vpop.f32.mrf.mxu2 }
  0xf6   : > { %v564_v23 = vadd.f32 %v554_v22, %v447_v5 }
  0xf8   : > { %v632_v24 = vpop.f32.mrf.mxu3  ;;  %v1269_v32 = vpop.f32.mrf.mxu0 }
  0xf9   : > { %v904_v1 = vpop.f32.mrf.mxu1  ;;  %v642_v28 = vadd.f32 %v632_v24, %v564_v23 }
  0xfa   : > { %v923_v31 = vadd.f32 %v904_v1, %v811_v47 }
  0xfb   : > { %v817_v34 = vadd.f32 %v807_v11, %v642_v28 }
  0xfd   : > { %v556_v36 = vpop.f32.mrf.mxu2 }
 0x100   : > { %v634_v37 = vpop.f32.mrf.mxu3  ;;  %v1271_v38 = vpop.f32.mrf.mxu0 }
 0x101   : > { %v906_v35 = vpop.f32.mrf.mxu1 }
 0x102   : > { %v924_v41 = vadd.f32 %v906_v35, %v812_v55 }
 0x105   : > { %v982_v33 = vpop.f32.mrf.mxu2 }
 0x106   : > { %v1001_v39 = vadd.f32 %v982_v33, %v923_v31 }
 0x108   : > { %v1157_v40 = vpop.f32.mrf.mxu3  ;;  %v1274_v60 = vpop.f32.mrf.mxu0 }
 0x109   : > { %v909_v20 = vpop.f32.mrf.mxu1  ;;  %v1176_v6 = vadd.f32 %v1157_v40, %v1001_v39 }
 0x10a   : > { %v925_v27 = vadd.f32 %v909_v20, %v813_v61 }
 0x10b   : > { %v2131_v21 = vadd.f32 %v1269_v32, %v1176_v6 }
 0x10d   : > { %v984_v43 = vpop.f32.mrf.mxu2 }
 0x10e   : > { %v1002_v44 = vadd.f32 %v984_v43, %v924_v41 }
 0x110   : > { %v1159_v58 = vpop.f32.mrf.mxu3  ;;  %v1276_v25 = vpop.f32.mrf.mxu0 }
 0x111   : > { %v911_v45 = vpop.f32.mrf.mxu1  ;;  %v1177_v47 = vadd.f32 %v1159_v58, %v1002_v44 }
 0x112   : > { %v926_v10 = vadd.f32 %v911_v45, %v814_v42 }
 0x113   : > { %v1289_v49 = vadd.f32 %v1271_v38, %v1177_v47 }
 0x115   : > { %v987_v50 = vpop.f32.mrf.mxu2 }
 0x116   : > { %v1003_v52 = vadd.f32 %v987_v50, %v925_v27 }
 0x118   : > { %v1162_v53 = vpop.f32.mrf.mxu3  ;;  %v1279_v57 = vpop.f32.mrf.mxu0 }
 0x119   : > { %v914_v54 = vpop.f32.mrf.mxu1  ;;  %v1178_v56 = vadd.f32 %v1162_v53, %v1003_v52 }
 0x11a   : > { %v927_v2 = vadd.f32 %v914_v54, %v815_v26 }
 0x11b   : > { %v1290_v59 = vadd.f32 %v1274_v60, %v1178_v56 }
 0x11d   : > { %v989_v15 = vpop.f32.mrf.mxu2 }
 0x11e   : > { %v1004_v46 = vadd.f32 %v989_v15, %v926_v10 }
 0x120   : > { %v1164_v51 = vpop.f32.mrf.mxu3  ;;  %v1281_v63 = vpop.f32.mrf.mxu0 }
 0x121   : > { %v916_v55 = vpop.f32.mrf.mxu1  ;;  %v1179_v62 = vadd.f32 %v1164_v51, %v1004_v46 }
 0x122   : > { %v928_v9 = vadd.f32 %v916_v55, %v816_v19 }
 0x123   : > { %v1291_v0 = vadd.f32 %v1276_v25, %v1179_v62 }
 0x125   : > { %v992_v3 = vpop.f32.mrf.mxu2 }
 0x126   : > { %v1005_v30 = vadd.f32 %v992_v3, %v927_v2 }
 0x128   : > { %v1167_v4 = vpop.f32.mrf.mxu3  ;;  %v1284_v8 = vpop.f32.mrf.mxu0 }
 0x129   : > { %v919_v61 = vpop.f32.mrf.mxu1  ;;  %v1180_v7 = vadd.f32 %v1167_v4, %v1005_v30 }
 0x12a   : > { %v929_v16 = vadd.f32 %v919_v61, %v817_v34 }
 0x12b   : > { %v1292_v48 = vadd.f32 %v1279_v57, %v1180_v7 }
 0x12d   : > { %v994_v12 = vpop.f32.mrf.mxu2 }
 0x12e   : > { %v1006_v5 = vadd.f32 %v994_v12, %v928_v9 }
 0x130   : > { %v1169_v11 = vpop.f32.mrf.mxu3  ;;  %v1286_v13 = vpop.f32.mrf.mxu0 }
 0x131   : > { %v921_v42 = vpop.f32.mrf.mxu1  ;;  %v1181_v29 = vadd.f32 %v1169_v11, %v1006_v5 }
 0x133   : > { %v1293_v14 = vadd.f32 %v1281_v63, %v1181_v29 }
 0x135   : > { %v997_v17 = vpop.f32.mrf.mxu2 }
 0x136   : > { %v1007_v18 = vadd.f32 %v997_v17, %v929_v16 }
 0x138   : > { %v1172_v22 = vpop.f32.mrf.mxu3 }
 0x139   : > { %v1182_v26 = vadd.f32 %v1172_v22, %v1007_v18 }
 0x13b   : > { %v1294_v23 = vadd.f32 %v1284_v8, %v1182_v26 }
 0x13c   : > { %1298 = sbr.rel (%p1609_p10) target bundleno = 328 (0x148), region = 32 }
 0x13d   : > { %v999_v24 = vpop.f32.mrf.mxu2 }
 0x140   : > { %v1174_v1 = vpop.f32.mrf.mxu3 }
 0x141   : > { %1299 = vst [vmem:[%s1843_s11] sm:$0xff] %v2131_v21 }
 0x142   : > { %1300 = vst [vmem:[%s1843_s11 + $0x8] sm:$0xff] %v1289_v49 }
 0x143   : > { %1301 = vst [vmem:[%s1843_s11 + $0x10] sm:$0xff] %v1290_v59 }
 0x144   : > { %1302 = vst [vmem:[%s1843_s11 + $0x18] sm:$0xff] %v1291_v0 }
 0x145   : > { %1303 = vst [vmem:[%s1843_s11 + $0x20] sm:$0xff] %v1292_v48 }
 0x146   : > { %1304 = vst [vmem:[%s1843_s11 + $0x28] sm:$0xff] %v1293_v14 }
 0x147   : > { %1305 = vst [vmem:[%s1843_s11 + $0x30] sm:$0xff] %v1294_v23 }
 0x148 PF: > { %p1610_p11 = scmp.eq.s32.totalorder %s1716_s9, 0 }
 0x14a   : > { %1309 = sbr.rel (%p1610_p11) target bundleno = 345 (0x159), region = 36 }
 0x14f   : > { %v1310_v19 = vld [vmem:[%s1843_s11] sm:$0xff]  ;;  %v1311_v28 = vld [vmem:[%s1843_s11 + $0x8] sm:$0xff]  ;;  %v1312_v31 = vld [vmem:[%s1843_s11 + $0x10] sm:$0xff] }
 0x150   : > { %v1317_v32 = vadd.f32 %v1310_v19, %v2131_v21  ;;  %v1318_v34 = vadd.f32 %v1311_v28, %v1289_v49  ;;  %v1319_v36 = vadd.f32 %v1312_v31, %v1290_v59  ;;  %v1313_v37 = vld [vmem:[%s1843_s11 + $0x18] sm:$0xff]  ;;  %v1314_v35 = vld [vmem:[%s1843_s11 + $0x20] sm:$0xff]  ;;  %v1315_v38 = vld [vmem:[%s1843_s11 + $0x28] sm:$0xff] }
 0x151   : > { %v1320_v33 = vadd.f32 %v1313_v37, %v1291_v0  ;;  %v1316_v39 = vld [vmem:[%s1843_s11 + $0x30] sm:$0xff]  ;;  %v1321_v40 = vadd.f32 %v1314_v35, %v1292_v48  ;;  %v1322_v20 = vadd.f32 %v1315_v38, %v1293_v14 }
 0x152   : > { %1324 = vst [vmem:[%s1843_s11] sm:$0xff] %v1317_v32  ;;  %v1323_v6 = vadd.f32 %v1316_v39, %v1294_v23 }
 0x153   : > { %1325 = vst [vmem:[%s1843_s11 + $0x8] sm:$0xff] %v1318_v34 }
 0x154   : > { %1326 = vst [vmem:[%s1843_s11 + $0x10] sm:$0xff] %v1319_v36 }
 0x155   : > { %1327 = vst [vmem:[%s1843_s11 + $0x18] sm:$0xff] %v1320_v33 }
 0x156   : > { %1328 = vst [vmem:[%s1843_s11 + $0x20] sm:$0xff] %v1321_v40 }
 0x157   : > { %1329 = vst [vmem:[%s1843_s11 + $0x28] sm:$0xff] %v1322_v20 }
 0x158   : > { %1330 = vst [vmem:[%s1843_s11 + $0x30] sm:$0xff] %v1323_v6 }
 0x159 PF: > { %s12_s15 = sadd.s32 1, %s1740_s15   ;;  %s2186_s9 = smov %s1728_s12 }
 0x15a   : > { %p9_p12 = scmp.ge.s32.totalorder %s12_s15, 110   ;;  %s2187_s10 = smov %s1732_s13 }
 0x15b   : > { %s2188_s11 = smov %s1736_s14  ;;  %s2189_s12 = smov %s2193_s16 }
 0x15c   : > { %s2190_s13 = smov %s2197_s17  ;;  %s2191_s14 = smov %s2201_s18 }
 0x15d   :  { %11 = sbr.rel (!%p9_p12) target bundleno = 4 (0x4), region = 79 }

</bundles_post_ra>
